<compile_context>
chip_gen: v7x
topology: tpu7x:2x2x1
jax: 0.10.0
libtpu: 0.0.40
codegen_flags: <defaults>
</compile_context>

<pallas_src>
import jax
import jax.numpy as jnp
from jax.experimental import pallas as pl
from jax.experimental.pallas import tpu as pltpu


def _box_filter_kernel(x_ref, bw_ref, bh_ref, o_ref):
    """One grid step: clipped (2r+1)x(2r+1) box sum of a [G_blk, Hp, Wp] block."""
    x = x_ref[...]                         # [gb, hp, wp], native input dtype
    bw = bw_ref[...]                       # [wp, wp] 0/1 band (x-compatible dtype)
    bh = bh_ref[...]                       # [hp, hp] 0/1 band, f32
    gb, hp, wp = x.shape

    # W-pass: out_w[g,i,k] = sum_{|j-k|<=r} x[g,i,j]  -> one big lane-dense matmul.
    t = jnp.dot(x.reshape(gb * hp, wp), bw,
                preferred_element_type=jnp.float32).reshape(gb, hp, wp)

    # H-pass: out[g,i,k] = sum_{|j-i|<=r} t[g,j,k].  Bh is symmetric, so
    # transpose the minor two dims (XLU), do one big lane-dense matmul,
    # transpose back.  No gb-wide broadcast of Bh, no small batched matmuls.
    tt = jnp.swapaxes(t, 1, 2).reshape(gb * wp, hp)          # [gb*wp, hp]
    u = jnp.dot(tt, bh, preferred_element_type=jnp.float32)   # [gb*wp, hp]
    o_ref[...] = jnp.swapaxes(u.reshape(gb, wp, hp), 1, 2).astype(o_ref.dtype)


def _band_matrix(n, r, dtype):
    idx = jnp.arange(n)
    return (jnp.abs(idx[:, None] - idx[None, :]) <= r).astype(dtype)


def _round_up(v, m):
    return -(-v // m) * m


def _vmem_policy():
    """(working-set budget, vmem_limit cap, force >=2 grid steps) per generation."""
    try:
        info = pltpu.get_tpu_info()
        cap = int(getattr(info, "vmem_capacity_bytes", 64 * 1024 * 1024))
    except Exception:
        cap = 64 * 1024 * 1024
    if cap >= 96 * 1024 * 1024:
        # v5e / v6e: 128 MiB VMEM, HBM-bound -> big blocks amortize DMA + step cost.
        return 64 * 1024 * 1024, 100 * 1024 * 1024, False
    # v7x: 64 MiB VMEM per TC, 3.2 TB/s HBM -> modest blocks, keep both cores busy.
    return 20 * 1024 * 1024, 40 * 1024 * 1024, True


def _pick_g_block(g, hp, wp, itemsize, budget, force_multi_step):
    """Largest power-of-two G-block whose working set fits the VMEM budget."""
    def est(gb):
        io = 4 * gb * hp * wp * itemsize       # double-buffered in + out blocks
        temps = 4 * gb * hp * wp * 4           # f32 intermediates (t, transposes, u)
        bands = 2 * (hp * hp + wp * wp) * 4    # resident band matrices
        return io + temps + bands

    gb = 1
    while gb < g and est(gb * 2) <= budget:
        gb *= 2
    if force_multi_step:
        # Megacore (v7x) only pays off with >=2 parallel grid steps.
        while gb > 1 and gb >= g:
            gb //= 2
    return gb, est(gb)


def box_filter(x, r):
    """Equivalent of BoxFilter.forward: diff_y(diff_x(x.cumsum(2), r).cumsum(3), r)."""
    assert x.ndim == 4
    n, c, h, w = x.shape
    assert h >= 2 * r + 1 and w >= 2 * r + 1

    g = n * c
    hp, wp = _round_up(h, 128), _round_up(w, 128)

    budget, limit_cap, force_multi = _vmem_policy()
    gb, est_bytes = _pick_g_block(g, hp, wp, x.dtype.itemsize, budget, force_multi)
    g_pad = _round_up(g, gb)

    # Zero padding: padded G slices, H rows and W cols are all zero, so the
    # clipped box sums over the true index range are unchanged; padding is
    # sliced off below.  Padded W makes the output store lane-dense.
    xg = jnp.pad(x.reshape(g, h, w),
                 ((0, g_pad - g), (0, hp - h), (0, wp - w)))

    # 0/1 bands are exact in bf16; match x's dtype for the first-pass operand so
    # bf16 inputs hit the native bf16 MXU path.  The H-pass operand (t) is f32.
    band_dtype = jnp.bfloat16 if x.dtype == jnp.bfloat16 else jnp.float32
    bw = _band_matrix(wp, r, band_dtype)
    bh = _band_matrix(hp, r, jnp.float32)

    vmem_limit = int(min(limit_cap,
                         max(32 * 1024 * 1024, est_bytes + 8 * 1024 * 1024)))

    flops = 2 * g_pad * (hp * hp * wp + hp * wp * wp)
    bytes_accessed = (2 * g_pad * hp * wp * x.dtype.itemsize
                      + (hp * hp + wp * wp) * 4)

    out = pl.pallas_call(
        _box_filter_kernel,
        out_shape=jax.ShapeDtypeStruct((g_pad, hp, wp), x.dtype),
        grid=(g_pad // gb,),
        in_specs=[
            pl.BlockSpec((gb, hp, wp), lambda i: (i, 0, 0)),
            pl.BlockSpec((wp, wp), lambda i: (0, 0)),   # resident band (W)
            pl.BlockSpec((hp, hp), lambda i: (0, 0)),   # resident band (H)
        ],
        out_specs=pl.BlockSpec((gb, hp, wp), lambda i: (i, 0, 0)),
        compiler_params=pltpu.CompilerParams(
            dimension_semantics=("parallel",),
            vmem_limit_bytes=vmem_limit,
        ),
        cost_estimate=pl.CostEstimate(flops=flops, transcendentals=0,
                                      bytes_accessed=bytes_accessed),
    )(xg, bw, bh)

    return out[:g, :h, :w].reshape(n, c, h, w)


# ---------------- pure-JAX reference (mirrors the PyTorch cumsum/diff code) ----
def _diff_x(inp, r):
    left = inp[:, :, r:2 * r + 1]
    middle = inp[:, :, 2 * r + 1:] - inp[:, :, :-2 * r - 1]
    right = inp[:, :, -1:] - inp[:, :, -2 * r - 1:-r - 1]
    return jnp.concatenate([left, middle, right], axis=2)


def _diff_y(inp, r):
    left = inp[:, :, :, r:2 * r + 1]
    middle = inp[:, :, :, 2 * r + 1:] - inp[:, :, :, :-2 * r - 1]
    right = inp[:, :, :, -1:] - inp[:, :, :, -2 * r - 1:-r - 1]
    return jnp.concatenate([left, middle, right], axis=3)


def _box_ref(u, r):
    return _diff_y(_diff_x(jnp.cumsum(u, axis=2), r).cumsum(axis=3), r)


if __name__ == "__main__":
    r = 2
    N, C, H, W = 2, 4, 16, 16   # H, W >= 2*r + 1

    key = jax.random.PRNGKey(0)
    x = jax.random.normal(key, (N, C, H, W), dtype=jnp.float32)

    out = box_filter(x, r)
    jax.block_until_ready(out)

    assert out.shape == (N, C, H, W), out.shape

    ref = _box_ref(x, r)
    max_err = float(jnp.max(jnp.abs(out - ref)))
    assert jnp.allclose(out, ref, rtol=1e-4, atol=1e-4), max_err

    print("KERNEL_OK")
</pallas_src>

<mosaic_0001>
module attributes {stable_mosaic.version = 11 : i64} {
  func.func @_box_filter_kernel(%arg0: i32, %arg1: memref<4x128x128xf32, #tpu.memory_space<vmem>>, %arg2: memref<128x128xf32, #tpu.memory_space<vmem>>, %arg3: memref<128x128xf32, #tpu.memory_space<vmem>>, %arg4: memref<4x128x128xf32, #tpu.memory_space<vmem>>) attributes {dimension_semantics = [#tpu.dimension_semantics<parallel>], iteration_bounds = array<i64: 2>, scalar_prefetch = 0 : i64, scratch_operands = 0 : i64, tpu.core_type = #tpu.core_type<tc>, window_params = [{transform_indices = @transform_0, window_bounds = array<i64: 4, 128, 128>}, {pipeline_mode = #tpu.pipeline_mode<synchronous>, transform_indices = @transform_1, window_bounds = array<i64: 128, 128>}, {pipeline_mode = #tpu.pipeline_mode<synchronous>, transform_indices = @transform_2, window_bounds = array<i64: 128, 128>}, {transform_indices = @transform_3, window_bounds = array<i64: 4, 128, 128>}]} {
    %c0 = arith.constant 0 : index
    %c0_0 = arith.constant 0 : index
    %c0_1 = arith.constant 0 : index
    %0 = vector.load %arg1[%c0, %c0_0, %c0_1] : memref<4x128x128xf32, #tpu.memory_space<vmem>>, vector<4x128x128xf32>
    %c0_2 = arith.constant 0 : index
    %c0_3 = arith.constant 0 : index
    %1 = vector.load %arg2[%c0_2, %c0_3] : memref<128x128xf32, #tpu.memory_space<vmem>>, vector<128x128xf32>
    %c0_4 = arith.constant 0 : index
    %c0_5 = arith.constant 0 : index
    %2 = vector.load %arg3[%c0_4, %c0_5] : memref<128x128xf32, #tpu.memory_space<vmem>>, vector<128x128xf32>
    %3 = vector.shape_cast %0 : vector<4x128x128xf32> to vector<512x128xf32>
    %cst = arith.constant dense<0.000000e+00> : vector<512x128xf32>
    %4 = tpu.matmul %3, %1, %cst {dimension_numbers = #tpu.dot_dimension_numbers<[1], [0], [0], [1], [0, 0, 1, 1], [], []>} : vector<512x128xf32>, vector<128x128xf32>, vector<512x128xf32> -> vector<512x128xf32>
    %5 = vector.shape_cast %4 : vector<512x128xf32> to vector<4x128x128xf32>
    %6 = tpu.transpose %5, [0, 2, 1] : vector<4x128x128xf32> -> vector<4x128x128xf32>
    %7 = vector.shape_cast %6 : vector<4x128x128xf32> to vector<512x128xf32>
    %cst_6 = arith.constant dense<0.000000e+00> : vector<512x128xf32>
    %8 = tpu.matmul %7, %2, %cst_6 {dimension_numbers = #tpu.dot_dimension_numbers<[1], [0], [0], [1], [0, 0, 1, 1], [], []>} : vector<512x128xf32>, vector<128x128xf32>, vector<512x128xf32> -> vector<512x128xf32>
    %9 = vector.shape_cast %8 : vector<512x128xf32> to vector<4x128x128xf32>
    %10 = tpu.transpose %9, [0, 2, 1] : vector<4x128x128xf32> -> vector<4x128x128xf32>
    %c0_7 = arith.constant 0 : index
    %c0_8 = arith.constant 0 : index
    %c0_9 = arith.constant 0 : index
    %11 = vector.load %arg4[%c0_7, %c0_8, %c0_9] : memref<4x128x128xf32, #tpu.memory_space<vmem>>, vector<4x128x128xf32>
    tpu.vector_store %arg4[%c0_7, %c0_8, %c0_9], %10 {strides = array<i32>} : memref<4x128x128xf32, #tpu.memory_space<vmem>>, vector<4x128x128xf32>,
    return
  }
  func.func @transform_0(%arg0: i32) -> (i32, i32, i32) {
    %c0_i32 = arith.constant 0 : i32
    %c0_i32_0 = arith.constant 0 : i32
    %c0_i32_1 = arith.constant 0 : i32
    return %arg0, %c0_i32, %c0_i32_0 : i32, i32, i32
  }
  func.func @transform_1(%arg0: i32) -> (i32, i32) {
    %c0_i32 = arith.constant 0 : i32
    %c0_i32_0 = arith.constant 0 : i32
    %c0_i32_1 = arith.constant 0 : i32
    return %c0_i32, %c0_i32_0 : i32, i32
  }
  func.func @transform_2(%arg0: i32) -> (i32, i32) {
    %c0_i32 = arith.constant 0 : i32
    %c0_i32_0 = arith.constant 0 : i32
    %c0_i32_1 = arith.constant 0 : i32
    return %c0_i32, %c0_i32_0 : i32, i32
  }
  func.func @transform_3(%arg0: i32) -> (i32, i32, i32) {
    %c0_i32 = arith.constant 0 : i32
    %c0_i32_0 = arith.constant 0 : i32
    %c0_i32_1 = arith.constant 0 : i32
    return %arg0, %c0_i32, %c0_i32_0 : i32, i32, i32
  }
}

</mosaic_0001>

<bundles_post_ra>
// kernel: tpu_custom_call.1
= control target key start
LH: loop header
LB: loop body
LE: loop exit
PB: predicated region body
PF: predicated region fallthrough
CT: control target
= control target key end

     0   :  { %8 = vsyncpa [#allocation3], 0  ;;  %s2655_s0 = inlined_call_operand.hbm [shape: f32[8,128,128], index: 0, kind: input, shape index: {}]   ;;  %s2656_s1 = inlined_call_operand.hbm [shape: f32[128,128], index: 1, kind: input, shape index: {}]   ;;  %s2657_s2 = inlined_call_operand.hbm [shape: f32[128,128], index: 2, kind: input, shape index: {}]   ;;  %s2658_s3 = inlined_call_operand.hbm [shape: f32[8,128,128], index: 3, kind: output, shape index: {}]  }
   0x1   :  { %10 = vsyncpa [#allocation3 + $0x1], 0 }
   0x2   :  { %11 = vsyncpa [#allocation6], 0 }
   0x3   :  { %12 = vsyncpa [#allocation4], 0 }
   0x4   :  { %14 = vsyncpa [#allocation4 + $0x1], 0  ;;  %s2275_s12 = smov 0   ;;  %s2277_s13 = smov 0  }
   0x5   :  { %s2279_s14 = smov 0   ;;  %s2281_s15 = smov 0  }
   0x6 LB: > { %s2296_s16 = sadd.s32 4294967295, %s2245_s15   ;;  %s1514_s17 = sadd.s32 4294967294, %s2245_s15   ;;  %s2245_s15 = sphi %s2281_s15, %s2678_s15   ;;  %s2241_s14 = sphi %s2279_s14, %s2677_s14   ;;  %s2237_s13 = sphi %s2277_s13, %s2676_s13   ;;  %s2233_s12 = sphi %s2275_s12, %s2675_s12  }
   0x7   : > { %p40_p0 = scmp.ne.s32.totalorder %s2237_s13, %s2233_s12  ;;  %p2659_p1 = scmp.eq.s32.totalorder %s2296_s16, 0 }
   0x8   : > { %p112_p3 = scmp.eq.s32.totalorder %s1514_s17, 1  ;;  %p1515_p5 = scmp.ge.s32.totalorder %s2245_s15, 1 }
   0x9   : > { %p2305_p4 = por %p2659_p1, %p40_p0  ;;  %p119_p7 = scmp.lt.s32.totalorder %s2245_s15, 3 }
   0xa   : > { %p2310_p6 = por %p112_p3, %p40_p0  ;;  %s2247_s21 = smov [#allocation5]  }
   0xb   : > { %s2662_s18 = scalar_select %p2305_p4, 1, 0 }
   0xc   : > { %s2663_s19 = scalar_select %p2310_p6, 1, 0 }
   0xd   : > { %p2315_p8 = pnand %p1515_p5, %p119_p7  ;;  %s131_s22 = sshll.u32 %s2247_s21, 4  ;;  %s2319_s22 = int_to_ptr.vmem [resolvable:$true] %s131_s22 }
   0xe   : > { %s2248_s24 = smov [#allocation7]   ;;  %s2089_s28 = scalar_lea.hbm %s2656_s1, 2048 }
   0xf   : > { %p2030_p9 = pneg %p2315_p8  ;;  %s144_s25 = sshll.u32 %s2248_s24, 4  ;;  %s2330_s25 = int_to_ptr.vmem [resolvable:$true] %s144_s25 }
  0x10   : > { %p2090_p12 = scmp.ne.s32.totalorder %s2656_s1, %s2089_s28  ;;  %p2096_p5 = scmp.lt.u32.totalorder %s2089_s28, %s2656_s1 }
  0x11   : > { %p2326_p11 = pnand %p2030_p9, %p2659_p1 }
  0x13   : > { %p2091_p13 = pneg %p2326_p11 }
  0x15   : > { %p2092_p0 = pnand %p2091_p13, %p2090_p12 }
  0x17   : > { %p2093_p3 = pneg %p2092_p0 }
  0x19   : > { %p2098_p7 = pnand %p2096_p5, %p2093_p3 }
  0x1b   : > { %2101 = shalt.err (!%p2098_p7)
}
  0x1c   : > { %s2102_s6 = scalar_lea.vmem %s2319_s22, 2048  ;;  %p2110_p2 = scmp.lt.s32.totalorder %s2319_s22, %s2319_s22 }
  0x1d   : > { %p2103_p9 = scmp.ne.s32.totalorder %s2319_s22, %s2102_s6  ;;  %p2111_p12 = scmp.lt.s32.totalorder %s2102_s6, %s2102_s6 }
  0x1f   : > { %p2105_p10 = pnand %p2103_p9, %p2091_p13  ;;  %p2112_p0 = por %p2111_p12, %p2110_p2 }
  0x21   : > { %p2106_p1 = pneg %p2105_p10 }
  0x23   : > { %p2113_p6 = pnand %p2112_p0, %p2106_p1 }
  0x25   : > { %2116 = shalt.err (!%p2113_p6)
}
  0x26   : > { %s2249_s7 = smov 128   ;;  %s2250_s8 = smov 8  }
  0x27   : > { %2033 = dma.hbm_to_vmem [thread:$0]  (!%p2326_p11), %s2656_s1, 2048, %s2319_s22, [#allocation6], %s2249_s7, %s2249_s7, %s2250_s8  }
  0x28   : > { %s2117_s21 = scalar_lea.hbm %s2657_s2, 2048 }
  0x29   : > { %p2118_p1 = scmp.ne.s32.totalorder %s2657_s2, %s2117_s21  ;;  %p2124_p10 = scmp.lt.u32.totalorder %s2117_s21, %s2657_s2 }
  0x2b   : > { %p2120_p2 = pnand %p2118_p1, %p2091_p13 }
  0x2d   : > { %p2121_p6 = pneg %p2120_p2 }
  0x2f   : > { %p2126_p3 = pnand %p2124_p10, %p2121_p6 }
  0x31   : > { %2129 = shalt.err (!%p2126_p3)
}
  0x32   : > { %s2130_s22 = scalar_lea.vmem %s2330_s25, 2048  ;;  %p2138_p12 = scmp.lt.s32.totalorder %s2330_s25, %s2330_s25 }
  0x33   : > { %p2131_p5 = scmp.ne.s32.totalorder %s2330_s25, %s2130_s22  ;;  %p2139_p0 = scmp.lt.s32.totalorder %s2130_s22, %s2130_s22 }
  0x35   : > { %p2133_p7 = pnand %p2131_p5, %p2091_p13  ;;  %p2140_p1 = por %p2139_p0, %p2138_p12 }
  0x37   : > { %p2134_p9 = pneg %p2133_p7 }
  0x39   : > { %p2141_p2 = pnand %p2140_p1, %p2134_p9 }
  0x3b   : > { %2144 = shalt.err (!%p2141_p2)
}
  0x3c   : > { %2036 = dma.hbm_to_vmem [thread:$0]  (!%p2326_p11), %s2657_s2, 2048, %s2330_s25, [#allocation6], %s2249_s7, %s2249_s7, %s2250_s8  }
  0x3d   : > { %s2391_s23 = sadd.s32 1, %s2245_s15   ;;  %s27_s4 = sadd.s32 1, %s2241_s14 }
  0x3e   : > { %s24_s5 = ssub.s32 %s2245_s15, %s2391_s23  ;;  %p34_p13 = scmp.ne.s32.totalorder %s2241_s14, %s2237_s13 }
  0x3f   : > { %p25_p6 = scmp.eq.s32.totalorder %s24_s5, 0  ;;  %p35_p10 = scmp.eq.s32.totalorder %s2245_s15, 0 }
  0x40   : > { %p2666_p3 = scmp.eq.s32.totalorder %s2296_s16, 1  ;;  %p2047_p7 = scmp.lt.s32.totalorder %s2245_s15, 2 }
  0x41   : > { %s2407_s9 = scalar_select %p25_p6, %s2241_s14, %s27_s4  }
  0x42   : > { %p2401_p5 = por %p2666_p3, %p34_p13  ;;  %p36_p9 = por %p35_p10, %p34_p13 }
  0x43   : > { %s158_s10 = sand.u32 1, %s2241_s14   ;;  %s1535_s25 = sshll.u32 %s2245_s15, 13 }
  0x44   : > { %s2667_s6 = scalar_select %p2401_p5, 1, 0 }
  0x45   : > { %s1519_s11 = sshll.u32 %s158_s10, 9  ;;  %s2414_s24 = scalar_lea.hbm %s2655_s0, %s1535_s25 }
  0x46   : > { %s162_s26 = scalar_lea.vmem [#allocation2], %s1519_s11  ;;  %p2418_p11 = pnand %p2047_p7, %p36_p9 }
  0x47   : > { %s170_s27 = sshll.u32 %s162_s26, 4  ;;  %s2422_s22 = scalar_lea.sflag [#allocation3], %s158_s10  ;;  %s2416_s27 = int_to_ptr.vmem [resolvable:$true] %s170_s27 }
  0x48   : > { %s2145_s29 = scalar_lea.hbm %s2414_s24, 8192  ;;  %p2147_p0 = pneg %p2418_p11 }
  0x49   : > { %p2146_p12 = scmp.ne.s32.totalorder %s2414_s24, %s2145_s29  ;;  %s2150_s5 = scalar_lea.hbm %s2655_s0, 16384 }
  0x4a   : > { %p2151_p13 = scmp.lt.u32.totalorder %s2414_s24, %s2655_s0  ;;  %p2152_p6 = scmp.lt.u32.totalorder %s2150_s5, %s2145_s29 }
  0x4b   : > { %p2148_p1 = pnand %p2147_p0, %p2146_p12  ;;  %p2154_p3 = scmp.lt.u32.totalorder %s2145_s29, %s2414_s24 }
  0x4c   : > { %p2153_p10 = por %p2152_p6, %p2151_p13 }
  0x4d   : > { %p2149_p2 = pneg %p2148_p1 }
  0x4e   : > { %p2155_p7 = por %p2154_p3, %p2153_p10 }
  0x50   : > { %p2156_p9 = pnand %p2155_p7, %p2149_p2 }
  0x52   : > { %2159 = shalt.err (!%p2156_p9)
}
  0x53   : > { %s2160_s10 = scalar_lea.vmem %s2416_s27, 8192  ;;  %s2251_s17 = smov [#allocation2]  }
  0x54   : > { %p2161_p12 = scmp.ne.s32.totalorder %s2416_s27, %s2160_s10  ;;  %s2165_s21 = sshll.u32 %s2251_s17, 4  ;;  %s2166_s21 = int_to_ptr.vmem [resolvable:$false] %s2165_s21 }
  0x55   : > { %s2167_s26 = scalar_lea.vmem %s2166_s21, 16384  ;;  %p2168_p4 = scmp.lt.s32.totalorder %s2416_s27, %s2166_s21 }
  0x56   : > { %p2163_p1 = pnand %p2161_p12, %p2147_p0  ;;  %p2169_p13 = scmp.lt.s32.totalorder %s2167_s26, %s2160_s10 }
  0x58   : > { %p2164_p5 = pneg %p2163_p1  ;;  %p2170_p6 = por %p2169_p13, %p2168_p4 }
  0x5a   : > { %p2171_p10 = pnand %p2170_p6, %p2164_p5 }
  0x5c   : > { %2174 = shalt.err (!%p2171_p10)
}
  0x5d   : > { %2040 = dma.hbm_to_vmem [thread:$0]  (!%p2418_p11), %s2414_s24, 8192, %s2416_s27, %s2422_s22, %s2249_s7, %s2249_s7, %s2250_s8  }
  0x5e   : > { %182 = sbr.rel (%p2315_p8) target bundleno = 1027 (0x403), region = 32  ;;  %s2456_s29 = sand.u32 (!%p2315_p8), 1, %s2237_s13  }
  0x5f   : > { %s1524_s30 = sshll.u32 (!%p2315_p8), %s2456_s29, 9  ;;  %s185_s4 = scalar_lea.sflag (!%p2315_p8), [#allocation3], %s2456_s29 }
  0x60   : > { %s2462_s28 = scalar_lea.vmem (!%p2315_p8), [#allocation2], %s1524_s30  ;;  %p2669_p4 = scmp.ne.s32.totalorder (!%p2315_p8), %s2662_s18, 0 }
  0x65   : > { %2220 = dma.done.wait (%p2669_p4), %s185_s4, 8192  }
  0x66   : > { %2222 = vsyncadd (%p2669_p4), %s185_s4, 4294959104  ;;  %p2670_p5 = scmp.eq.s32.totalorder %s2296_s16, 0 }
  0x68   : > { %2224 = dma.done.wait (%p2670_p5), [#allocation6], 4096   ;;  %p2671_p8 = pmov %p2670_p5 }
  0x69   : > { %v285_v0 = vld [vmem:[#allocation5] sm:$0xff]  ;;  %v286_v1 = vld [vmem:[#allocation5 + $0x8] sm:$0xff]  ;;  %v287_v2 = vld [vmem:[#allocation5 + $0x10] sm:$0xff]  ;;  %s2538_s18 = scalar_lea.vmem [#allocation8], %s1524_s30  ;;  %s1537_s20 = sshll.u32 %s2296_s16, 13 }
  0x6a   : > { %2226 = vsyncadd (%p2671_p8), [#allocation6], 4294963200  ;;  %v1954_v3 = vpack.c.bf16 %v286_v1, %v285_v0  ;;  %v288_v4 = vld [vmem:[#allocation5 + $0x18] sm:$0xff]  ;;  %v289_v6 = vld [vmem:[#allocation5 + $0x20] sm:$0xff]  ;;  %s1422_s7 = sshll.u32 %s2538_s18, 4  ;;  %s2608_s27 = scalar_lea.hbm %s2658_s3, %s1537_s20  ;;  %s2610_s7 = int_to_ptr.vmem [resolvable:$true] %s1422_s7 }
  0x6b   : > { %v1958_v5 = vpack.c.bf16 %v288_v4, %v287_v2  ;;  %v290_v7 = vld [vmem:[#allocation5 + $0x28] sm:$0xff]  ;;  %v221_v9 = vld [vmem:[%s2462_s28] sm:$0xff]  ;;  %v291_v10 = vld [vmem:[#allocation5 + $0x30] sm:$0xff]  ;;  %s1408_s22 = scalar_lea.sflag [#allocation4], %s2456_s29  ;;  %s2175_s5 = scalar_lea.vmem %s2610_s7, 8192 }
  0x6c   : > { %1955 = vmatprep.subr.bf16.mxu0 %v1954_v3  ;;  %v1962_v8 = vpack.c.bf16 %v290_v7, %v289_v6  ;;  %v292_v11 = vld [vmem:[#allocation5 + $0x38] sm:$0xff]  ;;  %1730 = vmatprep.mubr.f32.mxu0 %v221_v9  ;;  %v293_v13 = vld [vmem:[#allocation5 + $0x40] sm:$0xff]  ;;  %v294_v14 = vld [vmem:[#allocation5 + $0x48] sm:$0xff]  ;;  %p2176_p11 = scmp.ne.s32.totalorder %s2610_s7, %s2175_s5  ;;  %p2672_p0 = scmp.ne.s32.totalorder %s2667_s6, 0 }
  0x6d   : > { %1957 = vmatpush3.bf16.msra.mxu0 %v1954_v3  ;;  %v1966_v12 = vpack.c.bf16 %v292_v11, %v291_v10  ;;  %v1970_v15 = vpack.c.bf16 %v294_v14, %v293_v13  ;;  %v295_v16 = vld [vmem:[#allocation5 + $0x50] sm:$0xff]  ;;  %v296_v17 = vld [vmem:[#allocation5 + $0x58] sm:$0xff]  ;;  %v297_v19 = vld [vmem:[#allocation5 + $0x60] sm:$0xff]  ;;  %s2252_s16 = smov [#allocation8]  }
  0x6e   : > { %1959 = vmatprep.subr.bf16.mxu0 %v1958_v5  ;;  %v1974_v18 = vpack.c.bf16 %v296_v17, %v295_v16  ;;  %v298_v20 = vld [vmem:[#allocation5 + $0x68] sm:$0xff]  ;;  %v299_v22 = vld [vmem:[#allocation5 + $0x70] sm:$0xff]  ;;  %v300_v23 = vld [vmem:[#allocation5 + $0x78] sm:$0xff]  ;;  %p2177_p2 = pnand %p2176_p11, %p2672_p0  ;;  %s2179_s11 = sshll.u32 %s2252_s16, 4  ;;  %s2180_s11 = int_to_ptr.vmem [resolvable:$false] %s2179_s11 }
  0x6f   : > { %v1978_v21 = vpack.c.bf16 %v298_v20, %v297_v19  ;;  %v1982_v24 = vpack.c.bf16 %v300_v23, %v299_v22  ;;  %v222_v25 = vld [vmem:[%s2462_s28 + $0x8] sm:$0xff]  ;;  %v223_v26 = vld [vmem:[%s2462_s28 + $0x10] sm:$0xff]  ;;  %v224_v27 = vld [vmem:[%s2462_s28 + $0x18] sm:$0xff]  ;;  %s2181_s25 = scalar_lea.vmem %s2180_s11, 16384  ;;  %p2182_p7 = scmp.lt.s32.totalorder %s2610_s7, %s2180_s11 }
  0x70   : > { %v225_v28 = vld [vmem:[%s2462_s28 + $0x20] sm:$0xff]  ;;  %v226_v29 = vld [vmem:[%s2462_s28 + $0x28] sm:$0xff]  ;;  %v227_v30 = vld [vmem:[%s2462_s28 + $0x30] sm:$0xff]  ;;  %p2178_p3 = pneg %p2177_p2  ;;  %p2183_p9 = scmp.lt.s32.totalorder %s2181_s25, %s2175_s5 }
  0x71   : > { %1961 = vmatpush3.bf16.msra.mxu0 %v1958_v5  ;;  %v228_v31 = vld [vmem:[%s2462_s28 + $0x38] sm:$0xff]  ;;  %v229_v32 = vld [vmem:[%s2462_s28 + $0x40] sm:$0xff]  ;;  %v230_v33 = vld [vmem:[%s2462_s28 + $0x48] sm:$0xff] }
  0x72   : > { %1963 = vmatprep.subr.bf16.mxu0 %v1962_v8  ;;  %v231_v34 = vld [vmem:[%s2462_s28 + $0x50] sm:$0xff]  ;;  %v232_v35 = vld [vmem:[%s2462_s28 + $0x58] sm:$0xff]  ;;  %v233_v36 = vld [vmem:[%s2462_s28 + $0x60] sm:$0xff]  ;;  %p2184_p12 = por %p2183_p9, %p2182_p7 }
  0x73   : > { %v234_v37 = vld [vmem:[%s2462_s28 + $0x68] sm:$0xff]  ;;  %v235_v38 = vld [vmem:[%s2462_s28 + $0x70] sm:$0xff]  ;;  %v236_v39 = vld [vmem:[%s2462_s28 + $0x78] sm:$0xff] }
  0x74   : > { %v237_v40 = vld [vmem:[%s2462_s28 + $0x80] sm:$0xff]  ;;  %v238_v41 = vld [vmem:[%s2462_s28 + $0x88] sm:$0xff]  ;;  %v239_v42 = vld [vmem:[%s2462_s28 + $0x90] sm:$0xff]  ;;  %p2185_p1 = pnand %p2184_p12, %p2178_p3 }
  0x75   : > { %1965 = vmatpush3.bf16.msra.mxu0 %v1962_v8  ;;  %v240_v43 = vld [vmem:[%s2462_s28 + $0x98] sm:$0xff]  ;;  %v241_v44 = vld [vmem:[%s2462_s28 + $0xa0] sm:$0xff]  ;;  %v242_v45 = vld [vmem:[%s2462_s28 + $0xa8] sm:$0xff] }
  0x76   : > { %1967 = vmatprep.subr.bf16.mxu0 %v1966_v12  ;;  %v243_v46 = vld [vmem:[%s2462_s28 + $0xb0] sm:$0xff]  ;;  %v244_v47 = vld [vmem:[%s2462_s28 + $0xb8] sm:$0xff]  ;;  %v245_v48 = vld [vmem:[%s2462_s28 + $0xc0] sm:$0xff] }
  0x77   : > { %v246_v49 = vld [vmem:[%s2462_s28 + $0xc8] sm:$0xff]  ;;  %v247_v50 = vld [vmem:[%s2462_s28 + $0xd0] sm:$0xff]  ;;  %v248_v51 = vld [vmem:[%s2462_s28 + $0xd8] sm:$0xff] }
  0x78   : > { %v249_v52 = vld [vmem:[%s2462_s28 + $0xe0] sm:$0xff]  ;;  %v250_v53 = vld [vmem:[%s2462_s28 + $0xe8] sm:$0xff]  ;;  %v251_v54 = vld [vmem:[%s2462_s28 + $0xf0] sm:$0xff] }
  0x79   : > { %1969 = vmatpush3.bf16.msra.mxu0 %v1966_v12  ;;  %v252_v55 = vld [vmem:[%s2462_s28 + $0xf8] sm:$0xff]  ;;  %v253_v56 = vld [vmem:[%s2462_s28 + $0x100] sm:$0xff]  ;;  %v254_v57 = vld [vmem:[%s2462_s28 + $0x108] sm:$0xff] }
  0x7a   : > { %1971 = vmatprep.subr.bf16.mxu0 %v1970_v15  ;;  %v255_v58 = vld [vmem:[%s2462_s28 + $0x110] sm:$0xff]  ;;  %v256_v59 = vld [vmem:[%s2462_s28 + $0x118] sm:$0xff]  ;;  %v257_v60 = vld [vmem:[%s2462_s28 + $0x120] sm:$0xff] }
  0x7b   : > { %v258_v61 = vld [vmem:[%s2462_s28 + $0x128] sm:$0xff]  ;;  %v259_v62 = vld [vmem:[%s2462_s28 + $0x130] sm:$0xff]  ;;  %v260_v63 = vld [vmem:[%s2462_s28 + $0x138] sm:$0xff] }
  0x7c   : > { %v261_v0 = vld [vmem:[%s2462_s28 + $0x140] sm:$0xff]  ;;  %v262_v1 = vld [vmem:[%s2462_s28 + $0x148] sm:$0xff]  ;;  %v263_v2 = vld [vmem:[%s2462_s28 + $0x150] sm:$0xff] }
  0x7d   : > { %1973 = vmatpush3.bf16.msra.mxu0 %v1970_v15  ;;  %v264_v3 = vld [vmem:[%s2462_s28 + $0x158] sm:$0xff]  ;;  %v265_v4 = vld [vmem:[%s2462_s28 + $0x160] sm:$0xff]  ;;  %v266_v5 = vld [vmem:[%s2462_s28 + $0x168] sm:$0xff] }
  0x7e   : > { %1975 = vmatprep.subr.bf16.mxu0 %v1974_v18  ;;  %v267_v6 = vld [vmem:[%s2462_s28 + $0x170] sm:$0xff]  ;;  %v268_v7 = vld [vmem:[%s2462_s28 + $0x178] sm:$0xff]  ;;  %v269_v8 = vld [vmem:[%s2462_s28 + $0x180] sm:$0xff] }
  0x7f   : > { %v270_v9 = vld [vmem:[%s2462_s28 + $0x188] sm:$0xff]  ;;  %v271_v10 = vld [vmem:[%s2462_s28 + $0x190] sm:$0xff]  ;;  %v272_v11 = vld [vmem:[%s2462_s28 + $0x198] sm:$0xff] }
  0x80   : > { %v273_v12 = vld [vmem:[%s2462_s28 + $0x1a0] sm:$0xff]  ;;  %v274_v13 = vld [vmem:[%s2462_s28 + $0x1a8] sm:$0xff]  ;;  %v275_v14 = vld [vmem:[%s2462_s28 + $0x1b0] sm:$0xff] }
  0x81   : > { %1977 = vmatpush3.bf16.msra.mxu0 %v1974_v18  ;;  %v276_v15 = vld [vmem:[%s2462_s28 + $0x1b8] sm:$0xff]  ;;  %v277_v16 = vld [vmem:[%s2462_s28 + $0x1c0] sm:$0xff]  ;;  %v278_v17 = vld [vmem:[%s2462_s28 + $0x1c8] sm:$0xff] }
  0x82   : > { %1979 = vmatprep.subr.bf16.mxu0 %v1978_v21  ;;  %v279_v18 = vld [vmem:[%s2462_s28 + $0x1d0] sm:$0xff]  ;;  %v280_v19 = vld [vmem:[%s2462_s28 + $0x1d8] sm:$0xff]  ;;  %v281_v20 = vld [vmem:[%s2462_s28 + $0x1e0] sm:$0xff] }
  0x83   : > { %v283_v22 = vld [vmem:[%s2462_s28 + $0x1f0] sm:$0xff]  ;;  %v284_v23 = vld [vmem:[%s2462_s28 + $0x1f8] sm:$0xff] }
  0x85   : > { %1981 = vmatpush3.bf16.msra.mxu0 %v1978_v21  ;;  %v282_v21 = vld [vmem:[%s2462_s28 + $0x1e8] sm:$0xff] }
  0x86   : > { %1983 = vmatprep.subr.bf16.mxu0 %v1982_v24 }
  0x89   : > { %1985 = vmatpush3.bf16.msra.mxu0 %v1982_v24  ;;  %v301_v24 = vld [vmem:[#allocation7] sm:$0xff] }
  0x8c   : > { %1731 = vmatmul.mubr.f32.vlgmr.msra.gmra.mrb[0].mxu0 %v222_v25  ;;  %v302_v25 = vld [vmem:[#allocation7 + $0x8] sm:$0xff] }
  0x8d   : > { %1733 = vmatprep.mubr.f32.mxu0 %v223_v26  ;;  %v1986_v26 = vpack.c.bf16 %v302_v25, %v301_v24 }
  0x8f   : > { %1987 = vmatprep.subr.bf16.mxu1 %v1986_v26 }
  0x90   : > { %1734 = vmatmul.mubr.f32.gmra.mrb[2].mxu0 %v224_v27  ;;  %1989 = vmatpush3.bf16.msra.mxu1 %v1986_v26  ;;  %v303_v27 = vld [vmem:[#allocation7 + $0x10] sm:$0xff] }
  0x91   : > { %1736 = vmatprep.mubr.f32.mxu0 %v225_v28  ;;  %v304_v28 = vld [vmem:[#allocation7 + $0x18] sm:$0xff] }
  0x94   : > { %1737 = vmatmul.mubr.f32.gmra.mrb[4].mxu0 %v226_v29  ;;  %v1990_v29 = vpack.c.bf16 %v304_v28, %v303_v27 }
  0x95   : > { %1739 = vmatprep.mubr.f32.mxu0 %v227_v30  ;;  %v305_v30 = vld [vmem:[#allocation7 + $0x20] sm:$0xff] }
  0x96   : > { %1991 = vmatprep.subr.bf16.mxu1 %v1990_v29 }
  0x97   : > { %1993 = vmatpush3.bf16.msra.mxu1 %v1990_v29 }
  0x98   : > { %1740 = vmatmul.mubr.f32.gmra.mrb[6].mxu0 %v228_v31  ;;  %v306_v31 = vld [vmem:[#allocation7 + $0x28] sm:$0xff] }
  0x99   : > { %1742 = vmatprep.mubr.f32.mxu0 %v229_v32  ;;  %v1994_v32 = vpack.c.bf16 %v306_v31, %v305_v30 }
  0x9b   : > { %1995 = vmatprep.subr.bf16.mxu1 %v1994_v32 }
  0x9c   : > { %1743 = vmatmul.mubr.f32.gmra.mrb[8].mxu0 %v230_v33  ;;  %1997 = vmatpush3.bf16.msra.mxu1 %v1994_v32  ;;  %v307_v33 = vld [vmem:[#allocation7 + $0x30] sm:$0xff] }
  0x9d   : > { %1745 = vmatprep.mubr.f32.mxu0 %v231_v34  ;;  %v308_v34 = vld [vmem:[#allocation7 + $0x38] sm:$0xff] }
  0xa0   : > { %1746 = vmatmul.mubr.f32.gmra.mrb[10].mxu0 %v232_v35  ;;  %v1998_v35 = vpack.c.bf16 %v308_v34, %v307_v33 }
  0xa1   : > { %1748 = vmatprep.mubr.f32.mxu0 %v233_v36  ;;  %v309_v36 = vld [vmem:[#allocation7 + $0x40] sm:$0xff] }
  0xa2   : > { %1999 = vmatprep.subr.bf16.mxu1 %v1998_v35 }
  0xa3   : > { %2001 = vmatpush3.bf16.msra.mxu1 %v1998_v35 }
  0xa4   : > { %1749 = vmatmul.mubr.f32.gmra.mrb[12].mxu0 %v234_v37  ;;  %v310_v37 = vld [vmem:[#allocation7 + $0x48] sm:$0xff] }
  0xa5   : > { %1751 = vmatprep.mubr.f32.mxu0 %v235_v38  ;;  %v2002_v38 = vpack.c.bf16 %v310_v37, %v309_v36 }
  0xa7   : > { %2003 = vmatprep.subr.bf16.mxu1 %v2002_v38 }
  0xa8   : > { %1752 = vmatmul.mubr.f32.gmra.mrb[14].mxu0 %v236_v39  ;;  %2005 = vmatpush3.bf16.msra.mxu1 %v2002_v38  ;;  %v311_v39 = vld [vmem:[#allocation7 + $0x50] sm:$0xff] }
  0xa9   : > { %1754 = vmatprep.mubr.f32.mxu0 %v237_v40  ;;  %v312_v40 = vld [vmem:[#allocation7 + $0x58] sm:$0xff] }
  0xac   : > { %1755 = vmatmul.mubr.f32.gmra.mrb[16].mxu0 %v238_v41  ;;  %v2006_v41 = vpack.c.bf16 %v312_v40, %v311_v39 }
  0xad   : > { %1757 = vmatprep.mubr.f32.mxu0 %v239_v42  ;;  %v313_v42 = vld [vmem:[#allocation7 + $0x60] sm:$0xff] }
  0xae   : > { %2007 = vmatprep.subr.bf16.mxu1 %v2006_v41 }
  0xaf   : > { %2009 = vmatpush3.bf16.msra.mxu1 %v2006_v41 }
  0xb0   : > { %1758 = vmatmul.mubr.f32.gmra.mrb[18].mxu0 %v240_v43  ;;  %v314_v43 = vld [vmem:[#allocation7 + $0x68] sm:$0xff] }
  0xb1   : > { %1760 = vmatprep.mubr.f32.mxu0 %v241_v44  ;;  %v2010_v44 = vpack.c.bf16 %v314_v43, %v313_v42 }
  0xb3   : > { %2011 = vmatprep.subr.bf16.mxu1 %v2010_v44 }
  0xb4   : > { %1761 = vmatmul.mubr.f32.gmra.mrb[20].mxu0 %v242_v45  ;;  %2013 = vmatpush3.bf16.msra.mxu1 %v2010_v44 }
  0xb5   : > { %1763 = vmatprep.mubr.f32.mxu0 %v243_v46  ;;  %v315_v46 = vld [vmem:[#allocation7 + $0x70] sm:$0xff] }
  0xb8   : > { %1764 = vmatmul.mubr.f32.gmra.mrb[22].mxu0 %v244_v47  ;;  %v316_v47 = vld [vmem:[#allocation7 + $0x78] sm:$0xff] }
  0xb9   : > { %1766 = vmatprep.mubr.f32.mxu0 %v245_v48 }
  0xbc   : > { %1767 = vmatmul.mubr.f32.gmra.mrb[24].mxu0 %v246_v49  ;;  %v2014_v49 = vpack.c.bf16 %v316_v47, %v315_v46 }
  0xbd   : > { %1769 = vmatprep.mubr.f32.mxu0 %v247_v50 }
  0xbe   : > { %2015 = vmatprep.subr.bf16.mxu1 %v2014_v49 }
  0xbf   : > { %2017 = vmatpush3.bf16.msra.mxu1 %v2014_v49 }
  0xc0   : > { %1770 = vmatmul.mubr.f32.gmra.mrb[26].mxu0 %v248_v51 }
  0xc1   : > { %1772 = vmatprep.mubr.f32.mxu0 %v249_v52 }
  0xc4   : > { %1773 = vmatmul.mubr.f32.gmra.mrb[28].mxu0 %v250_v53 }
  0xc5   : > { %1775 = vmatprep.mubr.f32.mxu0 %v251_v54 }
  0xc8   : > { %1776 = vmatmul.mubr.f32.gmra.mrb[30].mxu0 %v252_v55 }
  0xc9   : > { %1778 = vmatprep.mubr.f32.mxu0 %v253_v56 }
  0xcc   : > { %1779 = vmatmul.mubr.f32.gmra.mrb[32].mxu0 %v254_v57 }
  0xcd   : > { %1781 = vmatprep.mubr.f32.mxu0 %v255_v58 }
  0xd0   : > { %1782 = vmatmul.mubr.f32.gmra.mrb[34].mxu0 %v256_v59 }
  0xd1   : > { %1784 = vmatprep.mubr.f32.mxu0 %v257_v60 }
  0xd4   : > { %1785 = vmatmul.mubr.f32.gmra.mrb[36].mxu0 %v258_v61 }
  0xd5   : > { %1787 = vmatprep.mubr.f32.mxu0 %v259_v62 }
  0xd8   : > { %1788 = vmatmul.mubr.f32.gmra.mrb[38].mxu0 %v260_v63 }
  0xd9   : > { %1790 = vmatprep.mubr.f32.mxu0 %v261_v0 }
  0xdc   : > { %1791 = vmatmul.mubr.f32.gmra.mrb[40].mxu0 %v262_v1 }
  0xdd   : > { %1793 = vmatprep.mubr.f32.mxu0 %v263_v2 }
  0xe0   : > { %1794 = vmatmul.mubr.f32.gmra.mrb[42].mxu0 %v264_v3 }
  0xe1   : > { %1796 = vmatprep.mubr.f32.mxu0 %v265_v4 }
  0xe4   : > { %1797 = vmatmul.mubr.f32.gmra.mrb[44].mxu0 %v266_v5 }
  0xe5   : > { %1799 = vmatprep.mubr.f32.mxu0 %v267_v6 }
  0xe8   : > { %1800 = vmatmul.mubr.f32.gmra.mrb[46].mxu0 %v268_v7 }
  0xe9   : > { %1802 = vmatprep.mubr.f32.mxu0 %v269_v8 }
  0xec   : > { %1803 = vmatmul.mubr.f32.gmra.mrb[48].mxu0 %v270_v9 }
  0xed   : > { %1805 = vmatprep.mubr.f32.mxu0 %v271_v10 }
  0xf0   : > { %1806 = vmatmul.mubr.f32.gmra.mrb[50].mxu0 %v272_v11 }
  0xf1   : > { %1808 = vmatprep.mubr.f32.mxu0 %v273_v12 }
  0xf4   : > { %1809 = vmatmul.mubr.f32.gmra.mrb[52].mxu0 %v274_v13 }
  0xf5   : > { %1811 = vmatprep.mubr.f32.mxu0 %v275_v14 }
  0xf8   : > { %1812 = vmatmul.mubr.f32.gmra.mrb[54].mxu0 %v276_v15 }
  0xf9   : > { %1814 = vmatprep.mubr.f32.mxu0 %v277_v16 }
  0xfc   : > { %1815 = vmatmul.mubr.f32.gmra.mrb[56].mxu0 %v278_v17 }
  0xfd   : > { %1817 = vmatprep.mubr.f32.mxu0 %v279_v18 }
 0x100   : > { %1818 = vmatmul.mubr.f32.gmra.mrb[58].mxu0 %v280_v19 }
 0x101   : > { %1820 = vmatprep.mubr.f32.mxu0 %v281_v20 }
 0x104   : > { %1821 = vmatmul.mubr.f32.gmra.mrb[60].mxu0 %v282_v21 }
 0x105   : > { %1823 = vmatprep.mubr.f32.mxu0 %v283_v22 }
 0x108   : > { %1824 = vmatmul.mubr.f32.gmra.mrb[62].mxu0 %v284_v23 }
 0x15f   : > { %v1732_v45 = vpop.f32.mrb[0].mxu0 }
 0x160   : > { %v383_v48 = vpop.f32.mrb[1].mxu0 }
 0x161   : > { %702 = vxpose.xlu0.b32.start [1/16] %v383_v48, 128 }
 0x163   : > { %v1735_v50 = vpop.f32.mrb[2].mxu0 }
 0x164   : > { %v393_v51 = vpop.f32.mrb[3].mxu0 }
 0x165   : > { %703 = vxpose.xlu0.b32.cont [2/16] %v1732_v45, 128 }
 0x167   : > { %v1738_v52 = vpop.f32.mrb[4].mxu0 }
 0x168   : > { %v403_v53 = vpop.f32.mrb[5].mxu0 }
 0x169   : > { %704 = vxpose.xlu0.b32.cont [3/16] %v393_v51, 128 }
 0x16b   : > { %v1741_v54 = vpop.f32.mrb[6].mxu0 }
 0x16c   : > { %v413_v55 = vpop.f32.mrb[7].mxu0 }
 0x16d   : > { %705 = vxpose.xlu0.b32.cont [4/16] %v1735_v50, 128 }
 0x16f   : > { %v1744_v56 = vpop.f32.mrb[8].mxu0 }
 0x170   : > { %v423_v57 = vpop.f32.mrb[9].mxu0 }
 0x171   : > { %706 = vxpose.xlu0.b32.cont [5/16] %v403_v53, 128 }
 0x173   : > { %v1747_v58 = vpop.f32.mrb[10].mxu0 }
 0x174   : > { %v433_v59 = vpop.f32.mrb[11].mxu0 }
 0x175   : > { %707 = vxpose.xlu0.b32.cont [6/16] %v1738_v52, 128 }
 0x177   : > { %v1750_v60 = vpop.f32.mrb[12].mxu0 }
 0x178   : > { %v443_v61 = vpop.f32.mrb[13].mxu0 }
 0x179   : > { %708 = vxpose.xlu0.b32.cont [7/16] %v413_v55, 128 }
 0x17b   : > { %v1753_v62 = vpop.f32.mrb[14].mxu0 }
 0x17c   : > { %v453_v63 = vpop.f32.mrb[15].mxu0 }
 0x17d   : > { %709 = vxpose.xlu0.b32.cont [8/16] %v1741_v54, 128 }
 0x17f   : > { %v1756_v0 = vpop.f32.mrb[16].mxu0 }
 0x180   : > { %v463_v1 = vpop.f32.mrb[17].mxu0 }
 0x181   : > { %710 = vxpose.xlu0.b32.cont [9/16] %v423_v57, 128  ;;  %734 = vxpose.xlu1.b32.start [1/16] %v463_v1, 128 }
 0x183   : > { %v1759_v2 = vpop.f32.mrb[18].mxu0 }
 0x184   : > { %v473_v3 = vpop.f32.mrb[19].mxu0 }
 0x185   : > { %711 = vxpose.xlu0.b32.cont [10/16] %v1744_v56, 128  ;;  %735 = vxpose.xlu1.b32.cont [2/16] %v1756_v0, 128 }
 0x187   : > { %v1762_v4 = vpop.f32.mrb[20].mxu0 }
 0x188   : > { %v483_v5 = vpop.f32.mrb[21].mxu0 }
 0x189   : > { %712 = vxpose.xlu0.b32.cont [11/16] %v433_v59, 128  ;;  %736 = vxpose.xlu1.b32.cont [3/16] %v473_v3, 128 }
 0x18b   : > { %v1765_v6 = vpop.f32.mrb[22].mxu0 }
 0x18c   : > { %v493_v7 = vpop.f32.mrb[23].mxu0 }
 0x18d   : > { %713 = vxpose.xlu0.b32.cont [12/16] %v1747_v58, 128  ;;  %737 = vxpose.xlu1.b32.cont [4/16] %v1759_v2, 128 }
 0x18f   : > { %v1768_v8 = vpop.f32.mrb[24].mxu0 }
 0x190   : > { %v503_v9 = vpop.f32.mrb[25].mxu0 }
 0x191   : > { %714 = vxpose.xlu0.b32.cont [13/16] %v443_v61, 128  ;;  %738 = vxpose.xlu1.b32.cont [5/16] %v483_v5, 128 }
 0x193   : > { %v1771_v10 = vpop.f32.mrb[26].mxu0 }
 0x194   : > { %v513_v11 = vpop.f32.mrb[27].mxu0 }
 0x195   : > { %715 = vxpose.xlu0.b32.cont [14/16] %v1750_v60, 128  ;;  %739 = vxpose.xlu1.b32.cont [6/16] %v1762_v4, 128 }
 0x197   : > { %v1774_v12 = vpop.f32.mrb[28].mxu0 }
 0x198   : > { %v523_v13 = vpop.f32.mrb[29].mxu0 }
 0x199   : > { %716 = vxpose.xlu0.b32.cont [15/16] %v453_v63, 128  ;;  %740 = vxpose.xlu1.b32.cont [7/16] %v493_v7, 128 }
 0x19b   : > { %v1777_v14 = vpop.f32.mrb[30].mxu0 }
 0x19c   : > { %v533_v15 = vpop.f32.mrb[31].mxu0 }
 0x19d   : > { %717 = vxpose.xlu0.b32.end [16/16] %v1753_v62, 128  ;;  %741 = vxpose.xlu1.b32.cont [8/16] %v1765_v6, 128 }
 0x19f   : > { %v1780_v16 = vpop.f32.mrb[32].mxu0 }
 0x1a0   : > { %v543_v17 = vpop.f32.mrb[33].mxu0 }
 0x1a1   : > { %742 = vxpose.xlu1.b32.cont [9/16] %v503_v9, 128  ;;  %766 = vxpose.xlu0.b32.start [1/16] %v543_v17, 128 }
 0x1a3   : > { %v1783_v18 = vpop.f32.mrb[34].mxu0 }
 0x1a4   : > { %v553_v19 = vpop.f32.mrb[35].mxu0 }
 0x1a5   : > { %743 = vxpose.xlu1.b32.cont [10/16] %v1768_v8, 128  ;;  %767 = vxpose.xlu0.b32.cont [2/16] %v1780_v16, 128 }
 0x1a7   : > { %v1786_v20 = vpop.f32.mrb[36].mxu0 }
 0x1a8   : > { %v563_v21 = vpop.f32.mrb[37].mxu0 }
 0x1a9   : > { %744 = vxpose.xlu1.b32.cont [11/16] %v513_v11, 128  ;;  %768 = vxpose.xlu0.b32.cont [3/16] %v553_v19, 128 }
 0x1ab   : > { %v1789_v22 = vpop.f32.mrb[38].mxu0 }
 0x1ac   : > { %v573_v23 = vpop.f32.mrb[39].mxu0 }
 0x1ad   : > { %745 = vxpose.xlu1.b32.cont [12/16] %v1771_v10, 128  ;;  %769 = vxpose.xlu0.b32.cont [4/16] %v1783_v18, 128 }
 0x1af   : > { %v1792_v24 = vpop.f32.mrb[40].mxu0 }
 0x1b0   : > { %v583_v25 = vpop.f32.mrb[41].mxu0 }
 0x1b1   : > { %746 = vxpose.xlu1.b32.cont [13/16] %v523_v13, 128  ;;  %770 = vxpose.xlu0.b32.cont [5/16] %v563_v21, 128 }
 0x1b3   : > { %v1795_v26 = vpop.f32.mrb[42].mxu0 }
 0x1b4   : > { %v593_v27 = vpop.f32.mrb[43].mxu0 }
 0x1b5   : > { %747 = vxpose.xlu1.b32.cont [14/16] %v1774_v12, 128  ;;  %771 = vxpose.xlu0.b32.cont [6/16] %v1786_v20, 128 }
 0x1b7   : > { %v1798_v28 = vpop.f32.mrb[44].mxu0 }
 0x1b8   : > { %v603_v29 = vpop.f32.mrb[45].mxu0 }
 0x1b9   : > { %748 = vxpose.xlu1.b32.cont [15/16] %v533_v15, 128  ;;  %772 = vxpose.xlu0.b32.cont [7/16] %v573_v23, 128 }
 0x1bb   : > { %v1801_v30 = vpop.f32.mrb[46].mxu0 }
 0x1bc   : > { %v613_v31 = vpop.f32.mrb[47].mxu0 }
 0x1bd   : > { %749 = vxpose.xlu1.b32.end [16/16] %v1777_v14, 128  ;;  %773 = vxpose.xlu0.b32.cont [8/16] %v1789_v22, 128 }
 0x1bf   : > { %v1804_v32 = vpop.f32.mrb[48].mxu0 }
 0x1c0   : > { %v623_v33 = vpop.f32.mrb[49].mxu0 }
 0x1c1   : > { %774 = vxpose.xlu0.b32.cont [9/16] %v583_v25, 128  ;;  %798 = vxpose.xlu1.b32.start [1/16] %v623_v33, 128 }
 0x1c3   : > { %v1807_v34 = vpop.f32.mrb[50].mxu0 }
 0x1c4   : > { %v633_v35 = vpop.f32.mrb[51].mxu0 }
 0x1c5   : > { %775 = vxpose.xlu0.b32.cont [10/16] %v1792_v24, 128  ;;  %799 = vxpose.xlu1.b32.cont [2/16] %v1804_v32, 128 }
 0x1c7   : > { %v1810_v36 = vpop.f32.mrb[52].mxu0 }
 0x1c8   : > { %v643_v37 = vpop.f32.mrb[53].mxu0 }
 0x1c9   : > { %776 = vxpose.xlu0.b32.cont [11/16] %v593_v27, 128  ;;  %800 = vxpose.xlu1.b32.cont [3/16] %v633_v35, 128 }
 0x1cb   : > { %v1813_v38 = vpop.f32.mrb[54].mxu0 }
 0x1cc   : > { %v653_v39 = vpop.f32.mrb[55].mxu0 }
 0x1cd   : > { %777 = vxpose.xlu0.b32.cont [12/16] %v1795_v26, 128  ;;  %801 = vxpose.xlu1.b32.cont [4/16] %v1807_v34, 128 }
 0x1cf   : > { %v1816_v40 = vpop.f32.mrb[56].mxu0 }
 0x1d0   : > { %v663_v41 = vpop.f32.mrb[57].mxu0 }
 0x1d1   : > { %778 = vxpose.xlu0.b32.cont [13/16] %v603_v29, 128  ;;  %802 = vxpose.xlu1.b32.cont [5/16] %v643_v37, 128 }
 0x1d3   : > { %v1819_v42 = vpop.f32.mrb[58].mxu0 }
 0x1d4   : > { %v673_v43 = vpop.f32.mrb[59].mxu0 }
 0x1d5   : > { %779 = vxpose.xlu0.b32.cont [14/16] %v1798_v28, 128  ;;  %803 = vxpose.xlu1.b32.cont [6/16] %v1810_v36, 128 }
 0x1d7   : > { %v1822_v44 = vpop.f32.mrb[60].mxu0 }
 0x1d8   : > { %v683_v45 = vpop.f32.mrb[61].mxu0 }
 0x1d9   : > { %780 = vxpose.xlu0.b32.cont [15/16] %v613_v31, 128  ;;  %804 = vxpose.xlu1.b32.cont [7/16] %v653_v39, 128 }
 0x1db   : > { %v1825_v46 = vpop.f32.mrb[62].mxu0 }
 0x1dc   : > { %v693_v47 = vpop.f32.mrb[63].mxu0 }
 0x1dd   : > { %781 = vxpose.xlu0.b32.end [16/16] %v1801_v30, 128  ;;  %805 = vxpose.xlu1.b32.cont [8/16] %v1813_v38, 128 }
 0x1e1   : > { %v718_v48 = vpop.trf.xlu0  ;;  %806 = vxpose.xlu1.b32.cont [9/16] %v663_v41, 128 }
 0x1e2   : > { %1858 = vmatprep.mubr.f32.mxu1 %v718_v48 }
 0x1e5   : > { %v719_v49 = vpop.trf.xlu0  ;;  %807 = vxpose.xlu1.b32.cont [10/16] %v1816_v40, 128 }
 0x1e6   : > { %1859 = vmatmul.mubr.f32.vlgmr.msra.gmra.mrb[0].mxu1 %v719_v49 }
 0x1e9   : > { %v720_v50 = vpop.trf.xlu0  ;;  %808 = vxpose.xlu1.b32.cont [11/16] %v673_v43, 128 }
 0x1ea   : > { %1861 = vmatprep.mubr.f32.mxu1 %v720_v50 }
 0x1ed   : > { %v721_v51 = vpop.trf.xlu0  ;;  %809 = vxpose.xlu1.b32.cont [12/16] %v1819_v42, 128 }
 0x1ee   : > { %1862 = vmatmul.mubr.f32.gmra.mrb[2].mxu1 %v721_v51 }
 0x1f1   : > { %v722_v52 = vpop.trf.xlu0  ;;  %810 = vxpose.xlu1.b32.cont [13/16] %v683_v45, 128 }
 0x1f2   : > { %1864 = vmatprep.mubr.f32.mxu1 %v722_v52 }
 0x1f5   : > { %v723_v53 = vpop.trf.xlu0  ;;  %811 = vxpose.xlu1.b32.cont [14/16] %v1822_v44, 128 }
 0x1f6   : > { %1865 = vmatmul.mubr.f32.gmra.mrb[4].mxu1 %v723_v53 }
 0x1f9   : > { %v724_v54 = vpop.trf.xlu0  ;;  %812 = vxpose.xlu1.b32.cont [15/16] %v693_v47, 128 }
 0x1fa   : > { %1867 = vmatprep.mubr.f32.mxu1 %v724_v54 }
 0x1fd   : > { %v725_v55 = vpop.trf.xlu0  ;;  %813 = vxpose.xlu1.b32.end [16/16] %v1825_v46, 128 }
 0x1fe   : > { %1868 = vmatmul.mubr.f32.gmra.mrb[6].mxu1 %v725_v55 }
 0x201   : > { %v726_v56 = vpop.trf.xlu0  ;;  %v750_v57 = vpop.trf.xlu1 }
 0x202   : > { %1870 = vmatprep.mubr.f32.mxu1 %v726_v56 }
 0x205   : > { %v727_v58 = vpop.trf.xlu0  ;;  %v751_v59 = vpop.trf.xlu1 }
 0x206   : > { %1871 = vmatmul.mubr.f32.gmra.mrb[8].mxu1 %v727_v58 }
 0x209   : > { %v728_v60 = vpop.trf.xlu0  ;;  %v752_v61 = vpop.trf.xlu1 }
 0x20a   : > { %1873 = vmatprep.mubr.f32.mxu1 %v728_v60 }
 0x20d   : > { %v729_v62 = vpop.trf.xlu0  ;;  %v753_v63 = vpop.trf.xlu1 }
 0x20e   : > { %1874 = vmatmul.mubr.f32.gmra.mrb[10].mxu1 %v729_v62 }
 0x211   : > { %v730_v0 = vpop.trf.xlu0  ;;  %v754_v1 = vpop.trf.xlu1 }
 0x212   : > { %1876 = vmatprep.mubr.f32.mxu1 %v730_v0 }
 0x215   : > { %v731_v2 = vpop.trf.xlu0  ;;  %v755_v3 = vpop.trf.xlu1 }
 0x216   : > { %1877 = vmatmul.mubr.f32.gmra.mrb[12].mxu1 %v731_v2 }
 0x219   : > { %v732_v4 = vpop.trf.xlu0  ;;  %v756_v5 = vpop.trf.xlu1 }
 0x21a   : > { %1879 = vmatprep.mubr.f32.mxu1 %v732_v4 }
 0x21d   : > { %v733_v6 = vpop.trf.xlu0  ;;  %v757_v7 = vpop.trf.xlu1 }
 0x21e   : > { %1880 = vmatmul.mubr.f32.gmra.mrb[14].mxu1 %v733_v6 }
 0x21f   : > { %1882 = vmatprep.mubr.f32.mxu1 %v750_v57 }
 0x221   : > { %v758_v8 = vpop.trf.xlu1  ;;  %v782_v9 = vpop.trf.xlu0 }
 0x222   : > { %1883 = vmatmul.mubr.f32.gmra.mrb[16].mxu1 %v751_v59 }
 0x223   : > { %1885 = vmatprep.mubr.f32.mxu1 %v752_v61 }
 0x225   : > { %v759_v10 = vpop.trf.xlu1  ;;  %v783_v11 = vpop.trf.xlu0 }
 0x226   : > { %1886 = vmatmul.mubr.f32.gmra.mrb[18].mxu1 %v753_v63 }
 0x227   : > { %1888 = vmatprep.mubr.f32.mxu1 %v754_v1 }
 0x229   : > { %v760_v12 = vpop.trf.xlu1  ;;  %v784_v13 = vpop.trf.xlu0 }
 0x22a   : > { %1889 = vmatmul.mubr.f32.gmra.mrb[20].mxu1 %v755_v3 }
 0x22b   : > { %1891 = vmatprep.mubr.f32.mxu1 %v756_v5 }
 0x22d   : > { %v761_v14 = vpop.trf.xlu1  ;;  %v785_v15 = vpop.trf.xlu0 }
 0x22e   : > { %1892 = vmatmul.mubr.f32.gmra.mrb[22].mxu1 %v757_v7 }
 0x22f   : > { %1894 = vmatprep.mubr.f32.mxu1 %v758_v8 }
 0x231   : > { %v762_v16 = vpop.trf.xlu1  ;;  %v786_v17 = vpop.trf.xlu0 }
 0x232   : > { %1895 = vmatmul.mubr.f32.gmra.mrb[24].mxu1 %v759_v10 }
 0x233   : > { %1897 = vmatprep.mubr.f32.mxu1 %v760_v12 }
 0x235   : > { %v763_v18 = vpop.trf.xlu1  ;;  %v787_v19 = vpop.trf.xlu0 }
 0x236   : > { %1898 = vmatmul.mubr.f32.gmra.mrb[26].mxu1 %v761_v14 }
 0x237   : > { %1900 = vmatprep.mubr.f32.mxu1 %v762_v16 }
 0x239   : > { %v764_v20 = vpop.trf.xlu1  ;;  %v788_v21 = vpop.trf.xlu0 }
 0x23a   : > { %1901 = vmatmul.mubr.f32.gmra.mrb[28].mxu1 %v763_v18 }
 0x23b   : > { %1903 = vmatprep.mubr.f32.mxu1 %v764_v20 }
 0x23d   : > { %v765_v22 = vpop.trf.xlu1  ;;  %v789_v23 = vpop.trf.xlu0 }
 0x23e   : > { %1904 = vmatmul.mubr.f32.gmra.mrb[30].mxu1 %v765_v22 }
 0x23f   : > { %1906 = vmatprep.mubr.f32.mxu1 %v782_v9 }
 0x241   : > { %v790_v24 = vpop.trf.xlu0  ;;  %v814_v25 = vpop.trf.xlu1 }
 0x242   : > { %1907 = vmatmul.mubr.f32.gmra.mrb[32].mxu1 %v783_v11 }
 0x243   : > { %1909 = vmatprep.mubr.f32.mxu1 %v784_v13 }
 0x245   : > { %v791_v26 = vpop.trf.xlu0  ;;  %v815_v27 = vpop.trf.xlu1 }
 0x246   : > { %1910 = vmatmul.mubr.f32.gmra.mrb[34].mxu1 %v785_v15 }
 0x247   : > { %1912 = vmatprep.mubr.f32.mxu1 %v786_v17 }
 0x249   : > { %v792_v28 = vpop.trf.xlu0  ;;  %v816_v29 = vpop.trf.xlu1 }
 0x24a   : > { %1913 = vmatmul.mubr.f32.gmra.mrb[36].mxu1 %v787_v19 }
 0x24b   : > { %1915 = vmatprep.mubr.f32.mxu1 %v788_v21 }
 0x24d   : > { %v793_v30 = vpop.trf.xlu0  ;;  %v817_v31 = vpop.trf.xlu1 }
 0x24e   : > { %1916 = vmatmul.mubr.f32.gmra.mrb[38].mxu1 %v789_v23 }
 0x24f   : > { %1918 = vmatprep.mubr.f32.mxu1 %v790_v24 }
 0x251   : > { %v794_v32 = vpop.trf.xlu0  ;;  %v818_v33 = vpop.trf.xlu1 }
 0x252   : > { %1919 = vmatmul.mubr.f32.gmra.mrb[40].mxu1 %v791_v26 }
 0x253   : > { %1921 = vmatprep.mubr.f32.mxu1 %v792_v28 }
 0x255   : > { %v795_v34 = vpop.trf.xlu0  ;;  %v819_v35 = vpop.trf.xlu1 }
 0x256   : > { %1922 = vmatmul.mubr.f32.gmra.mrb[42].mxu1 %v793_v30 }
 0x257   : > { %1924 = vmatprep.mubr.f32.mxu1 %v794_v32 }
 0x259   : > { %v796_v36 = vpop.trf.xlu0  ;;  %v820_v37 = vpop.trf.xlu1 }
 0x25a   : > { %1925 = vmatmul.mubr.f32.gmra.mrb[44].mxu1 %v795_v34 }
 0x25b   : > { %1927 = vmatprep.mubr.f32.mxu1 %v796_v36 }
 0x25d   : > { %v797_v38 = vpop.trf.xlu0  ;;  %v821_v39 = vpop.trf.xlu1 }
 0x25e   : > { %1928 = vmatmul.mubr.f32.gmra.mrb[46].mxu1 %v797_v38 }
 0x25f   : > { %1930 = vmatprep.mubr.f32.mxu1 %v814_v25 }
 0x261   : > { %v822_v40 = vpop.trf.xlu1 }
 0x262   : > { %1931 = vmatmul.mubr.f32.gmra.mrb[48].mxu1 %v815_v27 }
 0x263   : > { %1933 = vmatprep.mubr.f32.mxu1 %v816_v29 }
 0x265   : > { %v823_v41 = vpop.trf.xlu1 }
 0x266   : > { %1934 = vmatmul.mubr.f32.gmra.mrb[50].mxu1 %v817_v31 }
 0x267   : > { %1936 = vmatprep.mubr.f32.mxu1 %v818_v33 }
 0x269   : > { %v824_v42 = vpop.trf.xlu1 }
 0x26a   : > { %1937 = vmatmul.mubr.f32.gmra.mrb[52].mxu1 %v819_v35 }
 0x26b   : > { %1939 = vmatprep.mubr.f32.mxu1 %v820_v37 }
 0x26d   : > { %v825_v43 = vpop.trf.xlu1 }
 0x26e   : > { %1940 = vmatmul.mubr.f32.gmra.mrb[54].mxu1 %v821_v39 }
 0x26f   : > { %1942 = vmatprep.mubr.f32.mxu1 %v822_v40 }
 0x271   : > { %v826_v44 = vpop.trf.xlu1 }
 0x272   : > { %1943 = vmatmul.mubr.f32.gmra.mrb[56].mxu1 %v823_v41 }
 0x273   : > { %1945 = vmatprep.mubr.f32.mxu1 %v824_v42 }
 0x275   : > { %v827_v45 = vpop.trf.xlu1 }
 0x276   : > { %1946 = vmatmul.mubr.f32.gmra.mrb[58].mxu1 %v825_v43 }
 0x277   : > { %1948 = vmatprep.mubr.f32.mxu1 %v826_v44 }
 0x279   : > { %v828_v46 = vpop.trf.xlu1 }
 0x27a   : > { %1949 = vmatmul.mubr.f32.gmra.mrb[60].mxu1 %v827_v45 }
 0x27b   : > { %1951 = vmatprep.mubr.f32.mxu1 %v828_v46 }
 0x27d   : > { %v829_v47 = vpop.trf.xlu1 }
 0x27e   : > { %1952 = vmatmul.mubr.f32.gmra.mrb[62].mxu1 %v829_v47 }
 0x2b9   : > { %v1860_v48 = vpop.f32.mrb[0].mxu1 }
 0x2ba   : > { %v896_v49 = vpop.f32.mrb[1].mxu1 }
 0x2bb   : > { %1215 = vxpose.xlu0.b32.start [1/16] %v896_v49, 128 }
 0x2bf   : > { %1216 = vxpose.xlu0.b32.cont [2/16] %v1860_v48, 128 }
 0x2c1   : > { %v1863_v50 = vpop.f32.mrb[2].mxu1 }
 0x2c2   : > { %v906_v51 = vpop.f32.mrb[3].mxu1 }
 0x2c3   : > { %1217 = vxpose.xlu0.b32.cont [3/16] %v906_v51, 128 }
 0x2c7   : > { %1218 = vxpose.xlu0.b32.cont [4/16] %v1863_v50, 128 }
 0x2c9   : > { %v1866_v52 = vpop.f32.mrb[4].mxu1 }
 0x2ca   : > { %v916_v53 = vpop.f32.mrb[5].mxu1 }
 0x2cb   : > { %1219 = vxpose.xlu0.b32.cont [5/16] %v916_v53, 128 }
 0x2cf   : > { %1220 = vxpose.xlu0.b32.cont [6/16] %v1866_v52, 128 }
 0x2d1   : > { %v1869_v54 = vpop.f32.mrb[6].mxu1 }
 0x2d2   : > { %v926_v55 = vpop.f32.mrb[7].mxu1 }
 0x2d3   : > { %1221 = vxpose.xlu0.b32.cont [7/16] %v926_v55, 128 }
 0x2d7   : > { %1222 = vxpose.xlu0.b32.cont [8/16] %v1869_v54, 128 }
 0x2d9   : > { %v1872_v56 = vpop.f32.mrb[8].mxu1 }
 0x2da   : > { %v936_v57 = vpop.f32.mrb[9].mxu1 }
 0x2db   : > { %1223 = vxpose.xlu0.b32.cont [9/16] %v936_v57, 128 }
 0x2df   : > { %1224 = vxpose.xlu0.b32.cont [10/16] %v1872_v56, 128 }
 0x2e1   : > { %v1875_v58 = vpop.f32.mrb[10].mxu1 }
 0x2e2   : > { %v946_v59 = vpop.f32.mrb[11].mxu1 }
 0x2e3   : > { %1225 = vxpose.xlu0.b32.cont [11/16] %v946_v59, 128 }
 0x2e7   : > { %1226 = vxpose.xlu0.b32.cont [12/16] %v1875_v58, 128 }
 0x2e9   : > { %v1878_v60 = vpop.f32.mrb[12].mxu1 }
 0x2ea   : > { %v956_v61 = vpop.f32.mrb[13].mxu1 }
 0x2eb   : > { %1227 = vxpose.xlu0.b32.cont [13/16] %v956_v61, 128 }
 0x2ef   : > { %1228 = vxpose.xlu0.b32.cont [14/16] %v1878_v60, 128 }
 0x2f1   : > { %v1881_v62 = vpop.f32.mrb[14].mxu1 }
 0x2f2   : > { %v966_v63 = vpop.f32.mrb[15].mxu1 }
 0x2f3   : > { %1229 = vxpose.xlu0.b32.cont [15/16] %v966_v63, 128 }
 0x2f5   : > { %v1884_v0 = vpop.f32.mrb[16].mxu1 }
 0x2f6   : > { %v976_v1 = vpop.f32.mrb[17].mxu1 }
 0x2f7   : > { %1230 = vxpose.xlu0.b32.end [16/16] %v1881_v62, 128  ;;  %1247 = vxpose.xlu1.b32.start [1/16] %v976_v1, 128 }
 0x2f9   : > { %v1887_v2 = vpop.f32.mrb[18].mxu1 }
 0x2fa   : > { %v986_v3 = vpop.f32.mrb[19].mxu1 }
 0x2fb   : > { %1248 = vxpose.xlu1.b32.cont [2/16] %v1884_v0, 128 }
 0x2fd   : > { %v1890_v4 = vpop.f32.mrb[20].mxu1 }
 0x2fe   : > { %v996_v5 = vpop.f32.mrb[21].mxu1 }
 0x2ff   : > { %1249 = vxpose.xlu1.b32.cont [3/16] %v986_v3, 128 }
 0x301   : > { %v1893_v6 = vpop.f32.mrb[22].mxu1 }
 0x302   : > { %v1006_v7 = vpop.f32.mrb[23].mxu1 }
 0x303   : > { %1250 = vxpose.xlu1.b32.cont [4/16] %v1887_v2, 128 }
 0x305   : > { %v1896_v8 = vpop.f32.mrb[24].mxu1 }
 0x306   : > { %v1016_v9 = vpop.f32.mrb[25].mxu1 }
 0x307   : > { %1251 = vxpose.xlu1.b32.cont [5/16] %v996_v5, 128 }
 0x309   : > { %v1899_v10 = vpop.f32.mrb[26].mxu1 }
 0x30a   : > { %v1026_v11 = vpop.f32.mrb[27].mxu1 }
 0x30b   : > { %1252 = vxpose.xlu1.b32.cont [6/16] %v1890_v4, 128 }
 0x30d   : > { %v1902_v12 = vpop.f32.mrb[28].mxu1 }
 0x30e   : > { %v1036_v13 = vpop.f32.mrb[29].mxu1 }
 0x30f   : > { %1253 = vxpose.xlu1.b32.cont [7/16] %v1006_v7, 128 }
 0x311   : > { %v1905_v14 = vpop.f32.mrb[30].mxu1 }
 0x312   : > { %v1046_v15 = vpop.f32.mrb[31].mxu1 }
 0x313   : > { %1254 = vxpose.xlu1.b32.cont [8/16] %v1893_v6, 128 }
 0x315   : > { %v1908_v16 = vpop.f32.mrb[32].mxu1 }
 0x316   : > { %v1056_v17 = vpop.f32.mrb[33].mxu1 }
 0x317   : > { %1279 = vxpose.xlu0.b32.start [1/16] %v1056_v17, 128  ;;  %1255 = vxpose.xlu1.b32.cont [9/16] %v1016_v9, 128 }
 0x319   : > { %v1911_v18 = vpop.f32.mrb[34].mxu1 }
 0x31a   : > { %v1066_v19 = vpop.f32.mrb[35].mxu1 }
 0x31b   : > { %1280 = vxpose.xlu0.b32.cont [2/16] %v1908_v16, 128  ;;  %1256 = vxpose.xlu1.b32.cont [10/16] %v1896_v8, 128 }
 0x31d   : > { %v1914_v20 = vpop.f32.mrb[36].mxu1 }
 0x31e   : > { %v1076_v21 = vpop.f32.mrb[37].mxu1 }
 0x31f   : > { %1281 = vxpose.xlu0.b32.cont [3/16] %v1066_v19, 128  ;;  %1257 = vxpose.xlu1.b32.cont [11/16] %v1026_v11, 128 }
 0x321   : > { %v1917_v22 = vpop.f32.mrb[38].mxu1 }
 0x322   : > { %v1086_v23 = vpop.f32.mrb[39].mxu1 }
 0x323   : > { %1282 = vxpose.xlu0.b32.cont [4/16] %v1911_v18, 128  ;;  %1258 = vxpose.xlu1.b32.cont [12/16] %v1899_v10, 128 }
 0x325   : > { %v1920_v24 = vpop.f32.mrb[40].mxu1 }
 0x326   : > { %v1096_v25 = vpop.f32.mrb[41].mxu1 }
 0x327   : > { %1283 = vxpose.xlu0.b32.cont [5/16] %v1076_v21, 128  ;;  %1259 = vxpose.xlu1.b32.cont [13/16] %v1036_v13, 128 }
 0x329   : > { %v1923_v26 = vpop.f32.mrb[42].mxu1 }
 0x32a   : > { %v1106_v27 = vpop.f32.mrb[43].mxu1 }
 0x32b   : > { %1284 = vxpose.xlu0.b32.cont [6/16] %v1914_v20, 128  ;;  %1260 = vxpose.xlu1.b32.cont [14/16] %v1902_v12, 128 }
 0x32d   : > { %v1926_v28 = vpop.f32.mrb[44].mxu1 }
 0x32e   : > { %v1116_v29 = vpop.f32.mrb[45].mxu1 }
 0x32f   : > { %1285 = vxpose.xlu0.b32.cont [7/16] %v1086_v23, 128  ;;  %1261 = vxpose.xlu1.b32.cont [15/16] %v1046_v15, 128 }
 0x331   : > { %v1929_v30 = vpop.f32.mrb[46].mxu1 }
 0x332   : > { %v1126_v31 = vpop.f32.mrb[47].mxu1 }
 0x333   : > { %1286 = vxpose.xlu0.b32.cont [8/16] %v1917_v22, 128  ;;  %1262 = vxpose.xlu1.b32.end [16/16] %v1905_v14, 128 }
 0x335   : > { %v1932_v32 = vpop.f32.mrb[48].mxu1 }
 0x336   : > { %v1136_v33 = vpop.f32.mrb[49].mxu1 }
 0x337   : > { %1287 = vxpose.xlu0.b32.cont [9/16] %v1096_v25, 128  ;;  %1311 = vxpose.xlu1.b32.start [1/16] %v1136_v33, 128 }
 0x339   : > { %v1935_v34 = vpop.f32.mrb[50].mxu1 }
 0x33a   : > { %v1146_v35 = vpop.f32.mrb[51].mxu1 }
 0x33b   : > { %1288 = vxpose.xlu0.b32.cont [10/16] %v1920_v24, 128  ;;  %1312 = vxpose.xlu1.b32.cont [2/16] %v1932_v32, 128  ;;  %v1231_v36 = vpop.trf.xlu0 }
 0x33c   : > { %1343 = vst [vmem:[%s2538_s18] sm:$0xff] %v1231_v36 }
 0x33d   : > { %v1938_v37 = vpop.f32.mrb[52].mxu1 }
 0x33e   : > { %v1156_v38 = vpop.f32.mrb[53].mxu1 }
 0x33f   : > { %1289 = vxpose.xlu0.b32.cont [11/16] %v1106_v27, 128  ;;  %1313 = vxpose.xlu1.b32.cont [3/16] %v1146_v35, 128  ;;  %v1232_v39 = vpop.trf.xlu0 }
 0x340   : > { %1344 = vst [vmem:[%s2538_s18 + $0x8] sm:$0xff] %v1232_v39 }
 0x341   : > { %v1941_v40 = vpop.f32.mrb[54].mxu1 }
 0x342   : > { %v1166_v41 = vpop.f32.mrb[55].mxu1 }
 0x343   : > { %1290 = vxpose.xlu0.b32.cont [12/16] %v1923_v26, 128  ;;  %1314 = vxpose.xlu1.b32.cont [4/16] %v1935_v34, 128  ;;  %v1233_v42 = vpop.trf.xlu0 }
 0x344   : > { %1345 = vst [vmem:[%s2538_s18 + $0x10] sm:$0xff] %v1233_v42 }
 0x345   : > { %v1944_v43 = vpop.f32.mrb[56].mxu1 }
 0x346   : > { %v1176_v44 = vpop.f32.mrb[57].mxu1 }
 0x347   : > { %1291 = vxpose.xlu0.b32.cont [13/16] %v1116_v29, 128  ;;  %1315 = vxpose.xlu1.b32.cont [5/16] %v1156_v38, 128  ;;  %v1234_v45 = vpop.trf.xlu0 }
 0x348   : > { %1346 = vst [vmem:[%s2538_s18 + $0x18] sm:$0xff] %v1234_v45 }
 0x349   : > { %v1947_v46 = vpop.f32.mrb[58].mxu1 }
 0x34a   : > { %v1186_v47 = vpop.f32.mrb[59].mxu1 }
 0x34b   : > { %1292 = vxpose.xlu0.b32.cont [14/16] %v1926_v28, 128  ;;  %1316 = vxpose.xlu1.b32.cont [6/16] %v1938_v37, 128  ;;  %v1235_v48 = vpop.trf.xlu0 }
 0x34c   : > { %1347 = vst [vmem:[%s2538_s18 + $0x20] sm:$0xff] %v1235_v48 }
 0x34d   : > { %v1950_v49 = vpop.f32.mrb[60].mxu1 }
 0x34e   : > { %v1196_v50 = vpop.f32.mrb[61].mxu1 }
 0x34f   : > { %1293 = vxpose.xlu0.b32.cont [15/16] %v1126_v31, 128  ;;  %1317 = vxpose.xlu1.b32.cont [7/16] %v1166_v41, 128  ;;  %v1236_v51 = vpop.trf.xlu0 }
 0x350   : > { %1348 = vst [vmem:[%s2538_s18 + $0x28] sm:$0xff] %v1236_v51 }
 0x351   : > { %v1953_v52 = vpop.f32.mrb[62].mxu1 }
 0x352   : > { %v1206_v53 = vpop.f32.mrb[63].mxu1 }
 0x353   : > { %1294 = vxpose.xlu0.b32.end [16/16] %v1929_v30, 128  ;;  %1318 = vxpose.xlu1.b32.cont [8/16] %v1941_v40, 128  ;;  %v1237_v54 = vpop.trf.xlu0 }
 0x354   : > { %1349 = vst [vmem:[%s2538_s18 + $0x30] sm:$0xff] %v1237_v54 }
 0x357   : > { %1319 = vxpose.xlu1.b32.cont [9/16] %v1176_v44, 128  ;;  %v1238_v55 = vpop.trf.xlu0 }
 0x358   : > { %1350 = vst [vmem:[%s2538_s18 + $0x38] sm:$0xff] %v1238_v55 }
 0x35b   : > { %1320 = vxpose.xlu1.b32.cont [10/16] %v1944_v43, 128  ;;  %v1239_v56 = vpop.trf.xlu0 }
 0x35c   : > { %1351 = vst [vmem:[%s2538_s18 + $0x40] sm:$0xff] %v1239_v56 }
 0x35f   : > { %1321 = vxpose.xlu1.b32.cont [11/16] %v1186_v47, 128  ;;  %v1240_v57 = vpop.trf.xlu0 }
 0x360   : > { %1352 = vst [vmem:[%s2538_s18 + $0x48] sm:$0xff] %v1240_v57 }
 0x363   : > { %1322 = vxpose.xlu1.b32.cont [12/16] %v1947_v46, 128  ;;  %v1241_v58 = vpop.trf.xlu0 }
 0x364   : > { %1353 = vst [vmem:[%s2538_s18 + $0x50] sm:$0xff] %v1241_v58 }
 0x367   : > { %1323 = vxpose.xlu1.b32.cont [13/16] %v1196_v50, 128  ;;  %v1242_v59 = vpop.trf.xlu0 }
 0x368   : > { %1354 = vst [vmem:[%s2538_s18 + $0x58] sm:$0xff] %v1242_v59 }
 0x36b   : > { %1324 = vxpose.xlu1.b32.cont [14/16] %v1950_v49, 128  ;;  %v1243_v60 = vpop.trf.xlu0 }
 0x36c   : > { %1355 = vst [vmem:[%s2538_s18 + $0x60] sm:$0xff] %v1243_v60 }
 0x36f   : > { %1325 = vxpose.xlu1.b32.cont [15/16] %v1206_v53, 128  ;;  %v1244_v61 = vpop.trf.xlu0 }
 0x370   : > { %1356 = vst [vmem:[%s2538_s18 + $0x68] sm:$0xff] %v1244_v61 }
 0x373   : > { %1326 = vxpose.xlu1.b32.end [16/16] %v1953_v52, 128  ;;  %v1245_v62 = vpop.trf.xlu0 }
 0x374   : > { %1357 = vst [vmem:[%s2538_s18 + $0x70] sm:$0xff] %v1245_v62 }
 0x377   : > { %v1263_v63 = vpop.trf.xlu1  ;;  %v1246_v0 = vpop.trf.xlu0 }
 0x378   : > { %1359 = vst [vmem:[%s2538_s18 + $0x80] sm:$0xff] %v1263_v63  ;;  %1358 = vst [vmem:[%s2538_s18 + $0x78] sm:$0xff] %v1246_v0 }
 0x37b   : > { %v1264_v1 = vpop.trf.xlu1 }
 0x37c   : > { %1360 = vst [vmem:[%s2538_s18 + $0x88] sm:$0xff] %v1264_v1 }
 0x37f   : > { %v1265_v2 = vpop.trf.xlu1 }
 0x380   : > { %1361 = vst [vmem:[%s2538_s18 + $0x90] sm:$0xff] %v1265_v2 }
 0x383   : > { %v1266_v3 = vpop.trf.xlu1 }
 0x384   : > { %1362 = vst [vmem:[%s2538_s18 + $0x98] sm:$0xff] %v1266_v3 }
 0x387   : > { %v1267_v4 = vpop.trf.xlu1 }
 0x388   : > { %1363 = vst [vmem:[%s2538_s18 + $0xa0] sm:$0xff] %v1267_v4 }
 0x38b   : > { %v1268_v5 = vpop.trf.xlu1 }
 0x38c   : > { %1364 = vst [vmem:[%s2538_s18 + $0xa8] sm:$0xff] %v1268_v5 }
 0x38f   : > { %v1269_v6 = vpop.trf.xlu1 }
 0x390   : > { %1365 = vst [vmem:[%s2538_s18 + $0xb0] sm:$0xff] %v1269_v6 }
 0x393   : > { %v1270_v7 = vpop.trf.xlu1 }
 0x394   : > { %1366 = vst [vmem:[%s2538_s18 + $0xb8] sm:$0xff] %v1270_v7 }
 0x397   : > { %v1271_v8 = vpop.trf.xlu1  ;;  %v1295_v9 = vpop.trf.xlu0 }
 0x398   : > { %1367 = vst [vmem:[%s2538_s18 + $0xc0] sm:$0xff] %v1271_v8  ;;  %1375 = vst [vmem:[%s2538_s18 + $0x100] sm:$0xff] %v1295_v9 }
 0x39b   : > { %v1272_v10 = vpop.trf.xlu1  ;;  %v1296_v11 = vpop.trf.xlu0 }
 0x39c   : > { %1368 = vst [vmem:[%s2538_s18 + $0xc8] sm:$0xff] %v1272_v10  ;;  %1376 = vst [vmem:[%s2538_s18 + $0x108] sm:$0xff] %v1296_v11 }
 0x39f   : > { %v1273_v12 = vpop.trf.xlu1  ;;  %v1297_v13 = vpop.trf.xlu0 }
 0x3a0   : > { %1369 = vst [vmem:[%s2538_s18 + $0xd0] sm:$0xff] %v1273_v12  ;;  %1377 = vst [vmem:[%s2538_s18 + $0x110] sm:$0xff] %v1297_v13 }
 0x3a3   : > { %v1274_v14 = vpop.trf.xlu1  ;;  %v1298_v15 = vpop.trf.xlu0 }
 0x3a4   : > { %1370 = vst [vmem:[%s2538_s18 + $0xd8] sm:$0xff] %v1274_v14  ;;  %1378 = vst [vmem:[%s2538_s18 + $0x118] sm:$0xff] %v1298_v15 }
 0x3a7   : > { %v1275_v16 = vpop.trf.xlu1  ;;  %v1299_v17 = vpop.trf.xlu0 }
 0x3a8   : > { %1371 = vst [vmem:[%s2538_s18 + $0xe0] sm:$0xff] %v1275_v16  ;;  %1379 = vst [vmem:[%s2538_s18 + $0x120] sm:$0xff] %v1299_v17 }
 0x3ab   : > { %v1276_v18 = vpop.trf.xlu1  ;;  %v1300_v19 = vpop.trf.xlu0 }
 0x3ac   : > { %1372 = vst [vmem:[%s2538_s18 + $0xe8] sm:$0xff] %v1276_v18  ;;  %1380 = vst [vmem:[%s2538_s18 + $0x128] sm:$0xff] %v1300_v19 }
 0x3af   : > { %v1277_v20 = vpop.trf.xlu1  ;;  %v1301_v21 = vpop.trf.xlu0 }
 0x3b0   : > { %1373 = vst [vmem:[%s2538_s18 + $0xf0] sm:$0xff] %v1277_v20  ;;  %1381 = vst [vmem:[%s2538_s18 + $0x130] sm:$0xff] %v1301_v21 }
 0x3b3   : > { %v1278_v22 = vpop.trf.xlu1  ;;  %v1302_v23 = vpop.trf.xlu0 }
 0x3b4   : > { %1374 = vst [vmem:[%s2538_s18 + $0xf8] sm:$0xff] %v1278_v22  ;;  %1382 = vst [vmem:[%s2538_s18 + $0x138] sm:$0xff] %v1302_v23 }
 0x3b7   : > { %v1327_v24 = vpop.trf.xlu1  ;;  %v1303_v25 = vpop.trf.xlu0 }
 0x3b8   : > { %1391 = vst [vmem:[%s2538_s18 + $0x180] sm:$0xff] %v1327_v24  ;;  %1383 = vst [vmem:[%s2538_s18 + $0x140] sm:$0xff] %v1303_v25 }
 0x3bb   : > { %v1328_v26 = vpop.trf.xlu1  ;;  %v1304_v27 = vpop.trf.xlu0 }
 0x3bc   : > { %1392 = vst [vmem:[%s2538_s18 + $0x188] sm:$0xff] %v1328_v26  ;;  %1384 = vst [vmem:[%s2538_s18 + $0x148] sm:$0xff] %v1304_v27 }
 0x3bf   : > { %v1329_v28 = vpop.trf.xlu1  ;;  %v1305_v29 = vpop.trf.xlu0 }
 0x3c0   : > { %1393 = vst [vmem:[%s2538_s18 + $0x190] sm:$0xff] %v1329_v28  ;;  %1385 = vst [vmem:[%s2538_s18 + $0x150] sm:$0xff] %v1305_v29 }
 0x3c3   : > { %v1330_v30 = vpop.trf.xlu1  ;;  %v1306_v31 = vpop.trf.xlu0 }
 0x3c4   : > { %1394 = vst [vmem:[%s2538_s18 + $0x198] sm:$0xff] %v1330_v30  ;;  %1386 = vst [vmem:[%s2538_s18 + $0x158] sm:$0xff] %v1306_v31 }
 0x3c7   : > { %v1331_v32 = vpop.trf.xlu1  ;;  %v1307_v33 = vpop.trf.xlu0 }
 0x3c8   : > { %1395 = vst [vmem:[%s2538_s18 + $0x1a0] sm:$0xff] %v1331_v32  ;;  %1387 = vst [vmem:[%s2538_s18 + $0x160] sm:$0xff] %v1307_v33 }
 0x3cb   : > { %v1332_v34 = vpop.trf.xlu1  ;;  %v1308_v35 = vpop.trf.xlu0 }
 0x3cc   : > { %1396 = vst [vmem:[%s2538_s18 + $0x1a8] sm:$0xff] %v1332_v34  ;;  %1388 = vst [vmem:[%s2538_s18 + $0x168] sm:$0xff] %v1308_v35 }
 0x3cf   : > { %v1333_v36 = vpop.trf.xlu1  ;;  %v1309_v37 = vpop.trf.xlu0 }
 0x3d0   : > { %1397 = vst [vmem:[%s2538_s18 + $0x1b0] sm:$0xff] %v1333_v36  ;;  %1389 = vst [vmem:[%s2538_s18 + $0x170] sm:$0xff] %v1309_v37 }
 0x3d3   : > { %v1334_v38 = vpop.trf.xlu1  ;;  %v1310_v39 = vpop.trf.xlu0 }
 0x3d4   : > { %1398 = vst [vmem:[%s2538_s18 + $0x1b8] sm:$0xff] %v1334_v38  ;;  %1390 = vst [vmem:[%s2538_s18 + $0x178] sm:$0xff] %v1310_v39 }
 0x3d7   : > { %v1335_v40 = vpop.trf.xlu1 }
 0x3d8   : > { %1399 = vst [vmem:[%s2538_s18 + $0x1c0] sm:$0xff] %v1335_v40 }
 0x3db   : > { %v1336_v41 = vpop.trf.xlu1 }
 0x3dc   : > { %1400 = vst [vmem:[%s2538_s18 + $0x1c8] sm:$0xff] %v1336_v41 }
 0x3df   : > { %v1337_v42 = vpop.trf.xlu1 }
 0x3e0   : > { %1401 = vst [vmem:[%s2538_s18 + $0x1d0] sm:$0xff] %v1337_v42 }
 0x3e3   : > { %v1338_v43 = vpop.trf.xlu1 }
 0x3e4   : > { %1402 = vst [vmem:[%s2538_s18 + $0x1d8] sm:$0xff] %v1338_v43 }
 0x3e7   : > { %v1339_v44 = vpop.trf.xlu1 }
 0x3e8   : > { %1403 = vst [vmem:[%s2538_s18 + $0x1e0] sm:$0xff] %v1339_v44 }
 0x3eb   : > { %v1340_v45 = vpop.trf.xlu1 }
 0x3ec   : > { %1404 = vst [vmem:[%s2538_s18 + $0x1e8] sm:$0xff] %v1340_v45 }
 0x3ef   : > { %v1341_v46 = vpop.trf.xlu1 }
 0x3f0   : > { %1405 = vst [vmem:[%s2538_s18 + $0x1f0] sm:$0xff] %v1341_v46 }
 0x3f3   : > { %v1342_v47 = vpop.trf.xlu1 }
 0x3f4   : > { %1406 = vst [vmem:[%s2538_s18 + $0x1f8] sm:$0xff] %v1342_v47 }
 0x3f5   : > { %2188 = shalt.err (!%p2185_p1)
}
 0x3f6   : > { %s2189_s10 = scalar_lea.hbm %s2608_s27, 8192  ;;  %s2193_s26 = scalar_lea.hbm %s2658_s3, 16384 }
 0x3f7   : > { %p2190_p13 = scmp.ne.s32.totalorder %s2608_s27, %s2189_s10  ;;  %p2194_p4 = scmp.lt.u32.totalorder %s2608_s27, %s2658_s3 }
 0x3f8   : > { %p2195_p5 = scmp.lt.u32.totalorder %s2193_s26, %s2189_s10  ;;  %p2197_p11 = scmp.lt.u32.totalorder %s2189_s10, %s2608_s27 }
 0x3f9   : > { %p2191_p6 = pnand %p2190_p13, %p2672_p0 }
 0x3fa   : > { %p2196_p8 = por %p2195_p5, %p2194_p4 }
 0x3fb   : > { %p2192_p10 = pneg %p2191_p6 }
 0x3fc   : > { %p2198_p2 = por %p2197_p11, %p2196_p8 }
 0x3fe   : > { %p2199_p3 = pnand %p2198_p2, %p2192_p10 }
 0x400   : > { %2202 = shalt.err (!%p2199_p3)
}
 0x401   : > { %s2253_s28 = smov 128   ;;  %s2254_s18 = smov 8  }
 0x402   : > { %2028 = dma.vmem_to_hbm [thread:$0]  (%p2672_p0), %s2610_s7, 8192, %s2608_s27, %s1408_s22, %s2253_s28, %s2253_s28, %s2254_s18  }
 0x403 PF: > { %s1437_s20 = sand.u32 1, %s2233_s12   ;;  %p2673_p7 = scmp.ne.s32.totalorder %s2663_s19, 0 }
 0x404   : > { %p2674_p9 = scmp.ge.s32.totalorder %s2245_s15, 2  ;;  %s1438_s8 = scalar_lea.sflag [#allocation4], %s1437_s20 }
 0x406   : > { %p2042_p12 = pnand %p2674_p9, %p2673_p7 }
 0x408   : > { %2228 = dma.done.wait (!%p2042_p12), %s1438_s8, 8192  }
 0x409   : > { %2230 = vsyncadd (!%p2042_p12), %s1438_s8, 4294959104  ;;  %p17_p1 = scmp.ge.s32.totalorder %s2391_s23, 4   ;;  %s2675_s12 = smov %s2237_s13 }
 0x40a   : > { %s2676_s13 = smov %s2241_s14  ;;  %s2677_s14 = smov %s2407_s9 }
 0x40b   : > { %s2678_s15 = smov %s2391_s23  ;;  %19 = sbr.rel (!%p17_p1) target bundleno = 6 (0x6), region = 85 }
 0x412   :  { %1443 = vsyncpa [#allocation3], 1 }
 0x413   :  { %1445 = vsyncpa [#allocation3 + $0x1], 1 }
 0x414   :  { %1446 = vsyncpa [#allocation6], 1 }
 0x415   :  { %1447 = vsyncpa [#allocation4], 1 }
 0x416   :  { %1449 = vsyncpa [#allocation4 + $0x1], 1 }

</bundles_post_ra>
